<compile_context>
chip_gen: v6e
topology: v6e:2x2x1
jax: 0.10.0
libtpu: 0.0.40
codegen_flags: <defaults>
</compile_context>

<pallas_src>
import functools

import jax
import jax.numpy as jnp
from jax.experimental import pallas as pl
from jax.experimental.pallas import tpu as pltpu


def _round_up(x, m):
    return ((x + m - 1) // m) * m


def _cdiv(a, b):
    return -(-a // b)


def _vmem_params():
    """Generation-aware (tile_budget_bytes, vmem_limit_bytes).

    v5e/v6e have 128 MiB physical VMEM -> large budget; v7x has 64 MiB
    (32 MiB scoped default) -> conservative.  Unknown/failed query falls back
    to the conservative (v7x-safe) setting."""
    cap = 0
    try:
        cap = int(pltpu.get_tpu_info().vmem_capacity_bytes)
    except Exception:
        cap = 0
    if cap >= 100 * 1024 * 1024:                      # v5e / v6e (128 MiB)
        return 48 * 1024 * 1024, 96 * 1024 * 1024
    return 20 * 1024 * 1024, 32 * 1024 * 1024         # v7x / unknown


def _choose_tile_m(M, K, Nk, itemsize, vmem_budget):
    """Pick the M tile: as large as the VMEM budget allows (cap 8192 rows,
    8-aligned), force >= 2 grid steps when M is large (megacore), then
    rebalance so M-padding is minimal."""
    fixed = 2 * (K * Nk + Nk) * itemsize              # weight + bias (double-buffered)
    per_row = 2 * (K + Nk) * itemsize                 # x tile + out tile per row
    avail = max(vmem_budget - fixed, 8 * per_row)
    tm = min(8192, avail // per_row)
    tm = max(8, (tm // 8) * 8)
    # Keep >= 2 grid steps when there is enough work to split: the "parallel"
    # grid axis then shards across v7x's two TensorCores.  On single-core
    # chips this costs at most one extra (cheap) grid step.
    if M >= 1024:
        tm = min(tm, _round_up(_cdiv(M, 2), 8))
    num_tiles = max(1, _cdiv(M, tm))
    tm = _round_up(_cdiv(M, num_tiles), 8)            # rebalance -> minimal padding
    return tm, num_tiles


def _patch_embed_kernel(x_ref, w_ref, b_ref, o_ref):
    # x_ref: (tm, K) patch vectors, w_ref: (K, Nk), b_ref: (1, Nk),
    # o_ref: (tm, Nk).  Single MXU GEMM with f32 accumulation + bias add.
    acc = jnp.dot(x_ref[...], w_ref[...], preferred_element_type=jnp.float32)
    o_ref[...] = (acc + b_ref[...]).astype(o_ref.dtype)


def patch_embed_3d(x, weight, bias, patch_size):
    """Pallas implementation of PatchEmbed3D.forward.

    x:      (B, 1, D, H, W)  float32   (NCDHW, like PyTorch)
    weight: (embed_dim, 1, p, p, p)    (PyTorch Conv3d weight layout, OIDHW)
    bias:   (embed_dim,)
    returns (B, n_patches, embed_dim)
    """
    p = patch_size
    B, C, D, H, W = x.shape
    assert C == 1
    embed_dim = weight.shape[0]
    nd, nh, nw = D // p, H // p, W // p
    n_patches = nd * nh * nw

    # --- patch extraction: one XLA transpose-copy.  Channel-first
    # (c, kd, kh, kw) flatten order matches the OIDHW Conv3d weight reshape
    # (c == 1 here).  The M zero-pad below is fused into the same copy.
    xp = x.reshape(B, nd, p, nh, p, nw, p)
    xp = xp.transpose(0, 1, 3, 5, 2, 4, 6)            # (B, nd, nh, nw, p, p, p)
    patches = xp.reshape(B * n_patches, p * p * p)    # (M, K)

    M, K = patches.shape
    N = embed_dim

    # Conditional lane-dense padding of embed_dim: only when the extra HBM
    # output-write traffic is small.  Small N -> keep masked stores instead.
    Nup = _round_up(N, 128)
    if N % 128 == 0:
        Nk = N                                        # already lane-dense
    elif N >= 128 and (Nup - N) * 4 <= N:             # <= 25% write inflation
        Nk = Nup
    else:
        Nk = N

    w_flat = weight.reshape(embed_dim, K).T           # (K, N)
    b2d = bias.reshape(1, N)
    if Nk != N:
        w_flat = jnp.pad(w_flat, ((0, 0), (0, Nk - N)))
        b2d = jnp.pad(b2d, ((0, 0), (0, Nk - N)))

    itemsize = jnp.dtype(x.dtype).itemsize
    vmem_budget, vmem_limit = _vmem_params()
    tm, num_tiles = _choose_tile_m(M, K, Nk, itemsize, vmem_budget)
    M_pad = tm * num_tiles
    if M_pad != M:
        patches = jnp.pad(patches, ((0, M_pad - M), (0, 0)))

    cost = pl.CostEstimate(
        flops=2 * M_pad * K * Nk,
        transcendentals=0,
        bytes_accessed=itemsize * (M_pad * K + K * Nk + Nk + M_pad * Nk),
    )

    out = pl.pallas_call(
        _patch_embed_kernel,
        out_shape=jax.ShapeDtypeStruct((M_pad, Nk), x.dtype),
        grid_spec=pltpu.PrefetchScalarGridSpec(
            num_scalar_prefetch=0,
            grid=(num_tiles,),
            in_specs=[
                pl.BlockSpec((tm, K), lambda i: (i, 0)),     # patch rows (streamed)
                pl.BlockSpec((K, Nk), lambda i: (0, 0)),     # weight (resident)
                pl.BlockSpec((1, Nk), lambda i: (0, 0)),     # bias (resident)
            ],
            out_specs=pl.BlockSpec((tm, Nk), lambda i: (i, 0)),
        ),
        compiler_params=pltpu.CompilerParams(
            dimension_semantics=("parallel",),
            vmem_limit_bytes=vmem_limit,
        ),
        cost_estimate=cost,
    )(patches, w_flat, b2d)

    # Drop padding only if any was applied (avoid a needless copy pass).
    if Nk != N:
        out = out[:M, :N]
    elif M_pad != M:
        out = out[:M]
    return out.reshape(B, n_patches, embed_dim)


def _reference(x, weight, bias, patch_size):
    """Plain-JAX reference using a real strided 3D convolution."""
    p = patch_size
    y = jax.lax.conv_general_dilated(
        x, weight,
        window_strides=(p, p, p),
        padding="VALID",
        dimension_numbers=("NCDHW", "OIDHW", "NCDHW"),
    )
    y = y + bias.reshape(1, -1, 1, 1, 1)
    B, E = y.shape[0], y.shape[1]
    y = y.reshape(B, E, -1)              # flatten(2)
    return jnp.transpose(y, (0, 2, 1))   # transpose(1, 2)


if __name__ == "__main__":
    # Small shapes consistent with the module: img_size=(8, 8, 8), patch=4,
    # in_chans=1 (Conv3d is hard-coded to 1 input channel), embed_dim=32.
    B = 2
    img_size = (8, 8, 8)
    patch = 4
    embed_dim = 32

    key = jax.random.PRNGKey(0)
    kx, kw, kb = jax.random.split(key, 3)

    x = jax.random.normal(kx, (B, 1, *img_size), dtype=jnp.float32)
    # Deterministic parameter init (shapes from nn.Conv3d(1, embed_dim, patch, patch)).
    fan_in = 1 * patch * patch * patch
    bound = 1.0 / jnp.sqrt(fan_in)
    weight = jax.random.uniform(kw, (embed_dim, 1, patch, patch, patch),
                                dtype=jnp.float32, minval=-bound, maxval=bound)
    bias = jax.random.uniform(kb, (embed_dim,), dtype=jnp.float32,
                              minval=-bound, maxval=bound)

    fn = jax.jit(functools.partial(patch_embed_3d, patch_size=patch))
    out = fn(x, weight, bias)
    out = jax.block_until_ready(out)

    ref = _reference(x, weight, bias, patch)
    assert out.shape == ref.shape, (out.shape, ref.shape)
    assert jnp.allclose(out, ref, atol=1e-4, rtol=1e-4), \
        float(jnp.max(jnp.abs(out - ref)))

    print("KERNEL_OK")
</pallas_src>

<mosaic_0001>
module attributes {stable_mosaic.version = 11 : i64} {
  func.func @_patch_embed_kernel(%arg0: i32, %arg1: memref<16x64xf32, #tpu.memory_space<vmem>>, %arg2: memref<64x32xf32, #tpu.memory_space<vmem>>, %arg3: memref<1x32xf32, #tpu.memory_space<vmem>>, %arg4: memref<16x32xf32, #tpu.memory_space<vmem>>) attributes {dimension_semantics = [#tpu.dimension_semantics<parallel>], iteration_bounds = array<i64: 1>, scalar_prefetch = 0 : i64, scratch_operands = 0 : i64, tpu.core_type = #tpu.core_type<tc>, window_params = [{transform_indices = @transform_0, window_bounds = array<i64: 16, 64>}, {pipeline_mode = #tpu.pipeline_mode<synchronous>, transform_indices = @transform_1, window_bounds = array<i64: 64, 32>}, {pipeline_mode = #tpu.pipeline_mode<synchronous>, transform_indices = @transform_2, window_bounds = array<i64: 1, 32>}, {transform_indices = @transform_3, window_bounds = array<i64: 16, 32>}]} {
    %c0 = arith.constant 0 : index
    %c0_0 = arith.constant 0 : index
    %0 = vector.load %arg1[%c0, %c0_0] : memref<16x64xf32, #tpu.memory_space<vmem>>, vector<16x64xf32>
    %c0_1 = arith.constant 0 : index
    %c0_2 = arith.constant 0 : index
    %1 = vector.load %arg2[%c0_1, %c0_2] : memref<64x32xf32, #tpu.memory_space<vmem>>, vector<64x32xf32>
    %cst = arith.constant dense<0.000000e+00> : vector<16x32xf32>
    %2 = tpu.matmul %0, %1, %cst {dimension_numbers = #tpu.dot_dimension_numbers<[1], [0], [0], [1], [0, 0, 1, 1], [], []>} : vector<16x64xf32>, vector<64x32xf32>, vector<16x32xf32> -> vector<16x32xf32>
    %c0_3 = arith.constant 0 : index
    %c0_4 = arith.constant 0 : index
    %3 = vector.load %arg3[%c0_3, %c0_4] : memref<1x32xf32, #tpu.memory_space<vmem>>, vector<1x32xf32>
    %4 = vector.broadcast %3 : vector<1x32xf32> to vector<16x32xf32>
    %5 = arith.addf %2, %4 : vector<16x32xf32>
    %c0_5 = arith.constant 0 : index
    %c0_6 = arith.constant 0 : index
    %6 = vector.load %arg4[%c0_5, %c0_6] : memref<16x32xf32, #tpu.memory_space<vmem>>, vector<16x32xf32>
    tpu.vector_store %arg4[%c0_5, %c0_6], %5 {strides = array<i32>} : memref<16x32xf32, #tpu.memory_space<vmem>>, vector<16x32xf32>,
    return
  }
  func.func @transform_0(%arg0: i32) -> (i32, i32) {
    %c0_i32 = arith.constant 0 : i32
    %c0_i32_0 = arith.constant 0 : i32
    return %arg0, %c0_i32 : i32, i32
  }
  func.func @transform_1(%arg0: i32) -> (i32, i32) {
    %c0_i32 = arith.constant 0 : i32
    %c0_i32_0 = arith.constant 0 : i32
    %c0_i32_1 = arith.constant 0 : i32
    return %c0_i32, %c0_i32_0 : i32, i32
  }
  func.func @transform_2(%arg0: i32) -> (i32, i32) {
    %c0_i32 = arith.constant 0 : i32
    %c0_i32_0 = arith.constant 0 : i32
    %c0_i32_1 = arith.constant 0 : i32
    return %c0_i32, %c0_i32_0 : i32, i32
  }
  func.func @transform_3(%arg0: i32) -> (i32, i32) {
    %c0_i32 = arith.constant 0 : i32
    %c0_i32_0 = arith.constant 0 : i32
    return %arg0, %c0_i32 : i32, i32
  }
}

</mosaic_0001>

<bundles_post_ra>
// kernel: patch_embed_3d.1
= control target key start
LH: loop header
LB: loop body
LE: loop exit
PB: predicated region body
PF: predicated region fallthrough
CT: control target
= control target key end

     0   :  { %vm32_vm0 = vcmask 523264   ;;  %s251_s0 = inlined_call_operand.vmem [shape: f32[16,64], index: 0, kind: input, shape index: {}]   ;;  %s252_s1 = inlined_call_operand.vmem [shape: f32[64,32], index: 1, kind: input, shape index: {}]   ;;  %s253_s2 = inlined_call_operand.vmem [shape: f32[1,32], index: 2, kind: input, shape index: {}]   ;;  %s254_s3 = inlined_call_operand.hbm [shape: f32[16,32], index: 3, kind: output, shape index: {}]  }
   0x1   :  { %v24_v0 = vld [vmem:[%s252_s1 + $0x38] sm:$0xff]  ;;  %v23_v1 = vld [vmem:[%s252_s1 + $0x30] sm:$0xff]  ;;  %v22_v2 = vld [vmem:[%s252_s1 + $0x28] sm:$0xff] }
   0x2   :  { %146 = vmatprep.subr.mxu0 %v24_v0  ;;  %v15_v3 = vld [vmem:[%s251_s0] sm:$0xff] }
   0x3   :  { %147 = vmatpush3.msra.mxu0 %v24_v0  ;;  %162 = vmatprep.mubr.msk.f32.mxu0 %vm32_vm0, %v15_v3 }
   0x4   :  { %148 = vmatprep.subr.mxu0 %v23_v1 }
   0x5   :  { %8 = vsyncpa [#allocation3], 0  ;;  %149 = vmatpush3.msra.mxu0 %v23_v1  ;;  %v21_v4 = vld [vmem:[%s252_s1 + $0x20] sm:$0xff]  ;;  %v20_v5 = vld [vmem:[%s252_s1 + $0x18] sm:$0xff]  ;;  %s190_s7 = smov [#allocation2]   ;;  %vm114_vm1 = vcmask 261120  }
   0x6   :  { %150 = vmatprep.subr.mxu0 %v22_v2  ;;  %v19_v6 = vld [vmem:[%s252_s1 + $0x10] sm:$0xff]  ;;  %v18_v7 = vld [vmem:[%s252_s1 + $0x8] sm:$0xff]  ;;  %v17_v8 = vld [vmem:[%s252_s1] sm:$0xff]  ;;  %s122_s8 = sshll.u32 %s190_s7, 4  ;;  %s123_s8 = int_to_ptr.vmem [resolvable:$true] %s122_s8 }
   0x7   :  { %151 = vmatpush3.msra.mxu0 %v22_v2  ;;  %v16_v9 = vld [vmem:[%s251_s0 + $0x8] sm:$0xff]  ;;  %v133_v10 = vld [vmem:[%s253_s2] ss:$0 sm:$0xff]  ;;  %s168_s1 = scalar_lea.vmem %s123_s8, 256  ;;  %p173_p1 = scmp.lt.s32.totalorder %s123_s8, %s123_s8 }
   0x8   :  { %152 = vmatprep.subr.mxu0 %v21_v4  ;;  %p169_p0 = scmp.ne.s32.totalorder %s123_s8, %s168_s1  ;;  %p174_p2 = scmp.lt.s32.totalorder %s168_s1, %s168_s1 }
   0x9   :  { %153 = vmatpush3.msra.mxu0 %v21_v4 }
   0xa   :  { %154 = vmatprep.subr.mxu0 %v20_v5  ;;  %p175_p3 = por %p174_p2, %p173_p1 }
   0xb   :  { %155 = vmatpush3.msra.mxu0 %v20_v5 }
   0xc   :  { %156 = vmatprep.subr.mxu0 %v19_v6  ;;  %p176_p4 = pnand %p175_p3, %p169_p0 }
   0xd   :  { %157 = vmatpush3.msra.mxu0 %v19_v6 }
   0xe   :  { %158 = vmatprep.subr.mxu0 %v18_v7 }
   0xf   :  { %159 = vmatpush3.msra.mxu0 %v18_v7 }
  0x10   :  { %160 = vmatprep.subr.mxu0 %v17_v8 }
  0x11   :  { %161 = vmatpush3.msra.mxu0 %v17_v8 }
  0x12   :  { %163 = vmatmul.mubr.msk.f32.vlgmr.msra.gmra.mxu0 %vm32_vm0, %v16_v9 }
  0xd2   :  { %v164_v11 = vpop.f32.mrf.mxu0 }
  0xd3   :  { %v111_v12 = vadd.f32 %v164_v11, %v133_v10 }
  0xd4   :  { %v105_v13 = vpop.f32.mrf.mxu0 }
  0xd5   :  { %116 = vst.msk [vmem:[#allocation2 + $0x8] sm:$0xff] %vm114_vm1, %v111_v12  ;;  %v106_v14 = vadd.f32 %v133_v10, %v105_v13 }
  0xd7   :  { %115 = vst.msk [vmem:[#allocation2] sm:$0xff] %vm114_vm1, %v106_v14 }
  0xd8   :  { %179 = shalt.err (!%p176_p4)
}
  0xd9   :  { %s191_s0 = smov 128   ;;  %s192_s9 = smov 8  }
  0xda   :  { %128 = dma.vmem_to_hbm [thread:$0]  %s123_s8, 256, %s254_s3, [#allocation3], %s191_s0, %s191_s0, %s192_s9  }
  0xdb   :  { %188 = dma.done.wait [#allocation3], 256  }
  0xdc   :  { %189 = vsyncadd [#allocation3], 4294967040 }
  0xdd   :  { %132 = vsyncpa [#allocation3], 1 }

</bundles_post_ra>
